<compile_context>
chip_gen: v7x
topology: tpu7x:2x2x1
jax: 0.10.0
libtpu: 0.0.40
codegen_flags: <defaults>
</compile_context>

<pallas_src>
import jax
import jax.numpy as jnp
from jax import lax
from jax.experimental import pallas as pl
from jax.experimental.pallas import tpu as pltpu

NEURONS = 20   # hidden size from the module
OUT_DIM = 2    # final projection size


def mlp_encoder_kernel(x_ref, w1_ref, b1_ref, w2_ref, b2_ref, o_ref):
    # x_ref: [TB, D]   w1_ref: [H, D]   b1_ref: [1, H]
    # w2_ref: [O, H]   b2_ref: [1, O]   o_ref: [TB, O]
    x = x_ref[...]                                    # f32 or bf16, as supplied

    # Layer 1: contract D against W1's input dim: [TB, D] x [H, D] -> [TB, H]
    # (MXU, f32 accumulation regardless of input dtype).
    h = lax.dot_general(
        x, w1_ref[...],
        dimension_numbers=(((1,), (1,)), ((), ())),
        preferred_element_type=jnp.float32)

    # Bias + tanh in f32 (VPU + EUP).
    h = jnp.tanh(h + b1_ref[...])

    # Layer 2: tiny [TB, H] x [O, H] -> [TB, O]; keep it f32.
    y = lax.dot_general(
        h, w2_ref[...],
        dimension_numbers=(((1,), (1,)), ((), ())),
        preferred_element_type=jnp.float32)

    o_ref[...] = (y + b2_ref[...]).astype(o_ref.dtype)


def _round_up(n, m):
    return -(-n // m) * m


def mlp_encoder(x, w1, b1, w2, b2, *, block_b=16384):
    """Forward pass of M.

    x  : [B, D]  (f32, or bf16 if the producer emits bf16 end-to-end)
    w1 : [H, D]  (PyTorch Linear layout [out_features, in_features])
    b1 : [H]
    w2 : [O, H]
    b2 : [O]
    returns [B, O]
    """
    B, D = x.shape
    H, D2 = w1.shape
    O, H2 = w2.shape
    assert D2 == D and H2 == H

    out_dtype = jnp.result_type(x.dtype, w2.dtype)

    # Layer-1 compute dtype follows x.  Cast W1 once here (tiny + resident in
    # VMEM) rather than every grid step inside the kernel.
    w1 = w1.astype(x.dtype)
    b1_2d = b1.reshape(1, H).astype(jnp.float32)
    w2 = w2.astype(jnp.float32)
    b2_2d = b2.reshape(1, O).astype(jnp.float32)

    # --- batch-tile selection -------------------------------------------------
    x_isz = jnp.dtype(x.dtype).itemsize
    o_isz = jnp.dtype(out_dtype).itemsize
    # Keep double-buffered x + double-buffered out + in-kernel temporaries well
    # inside every generation's default scoped VMEM (v5e: 16 MiB).
    vmem_budget = 10 * 1024 * 1024
    per_row = 3 * D * x_isz + 2 * O * o_isz + H * 4
    tb_cap = max(8, (vmem_budget // per_row) // 8 * 8)

    if B <= min(2048, block_b):
        # Small batch: one full-batch block (legal for any B; launch-overhead
        # dominated anyway).
        tb = B
    else:
        # Large batch: big tiles, but at least 2 grid steps so the "parallel"
        # batch axis can split across v7x's two TensorCores.
        tb = min(block_b, -(-B // 2), tb_cap)
        tb = max(8, _round_up(tb, 8))
    num_blocks = pl.cdiv(B, tb)          # ragged tail handled by block masking

    return pl.pallas_call(
        mlp_encoder_kernel,
        out_shape=jax.ShapeDtypeStruct((B, O), out_dtype),
        grid=(num_blocks,),
        in_specs=[
            pl.BlockSpec((tb, D), lambda i: (i, 0)),   # x tile, streamed/pipelined
            pl.BlockSpec((H, D), lambda i: (0, 0)),    # W1 resident
            pl.BlockSpec((1, H), lambda i: (0, 0)),    # b1 resident
            pl.BlockSpec((O, H), lambda i: (0, 0)),    # W2 resident
            pl.BlockSpec((1, O), lambda i: (0, 0)),    # b2 resident
        ],
        out_specs=pl.BlockSpec((tb, O), lambda i: (i, 0)),
        compiler_params=pltpu.CompilerParams(
            dimension_semantics=("parallel",),         # v7x: shard batch over 2 TCs
        ),
    )(x, w1, b1_2d, w2, b2_2d)


if __name__ == "__main__":
    key = jax.random.PRNGKey(0)
    k_x, k_w1, k_b1, k_w2, k_b2 = jax.random.split(key, 5)

    D = 32        # X.shape[1] — feature dimension of the input data
    H = NEURONS
    O = OUT_DIM

    # Deterministic init matching PyTorch Linear's uniform(-1/sqrt(fan_in), ...)
    lim1 = 1.0 / float(jnp.sqrt(D))
    lim2 = 1.0 / float(jnp.sqrt(H))
    w1 = jax.random.uniform(k_w1, (H, D), jnp.float32, -lim1, lim1)   # [out, in]
    b1 = jax.random.uniform(k_b1, (H,), jnp.float32, -lim1, lim1)
    w2 = jax.random.uniform(k_w2, (O, H), jnp.float32, -lim2, lim2)   # [out, in]
    b2 = jax.random.uniform(k_b2, (O,), jnp.float32, -lim2, lim2)

    # --- small-batch correctness (single full-batch block) --------------------
    B = 64
    x = jax.random.normal(k_x, (B, D), jnp.float32)
    ref = jnp.tanh(x @ w1.T + b1) @ w2.T + b2
    out = jax.block_until_ready(mlp_encoder(x, w1, b1, w2, b2))
    assert out.shape == (B, O)
    assert jnp.allclose(out, ref, atol=1e-5, rtol=1e-5)

    # --- multi-block + ragged-tail path (4 grid steps, last block partial) ----
    B2 = 1000
    x2 = jax.random.normal(k_x, (B2, D), jnp.float32)
    ref2 = jnp.tanh(x2 @ w1.T + b1) @ w2.T + b2
    out2 = jax.block_until_ready(mlp_encoder(x2, w1, b1, w2, b2, block_b=256))
    assert out2.shape == (B2, O)
    assert jnp.allclose(out2, ref2, atol=1e-5, rtol=1e-5)

    # --- bf16-input path (x arrives bf16 end-to-end; no extra wrapper cast) ---
    xb = x.astype(jnp.bfloat16)
    refb = jnp.tanh(xb.astype(jnp.float32) @ w1.T + b1) @ w2.T + b2
    outb = jax.block_until_ready(mlp_encoder(xb, w1, b1, w2, b2))
    assert outb.shape == (B, O)
    assert jnp.allclose(outb, refb, atol=2e-2, rtol=2e-2)

    print("KERNEL_OK")
</pallas_src>

<mosaic_0001>
module attributes {stable_mosaic.version = 11 : i64} {
  func.func @mlp_encoder_kernel(%arg0: i32, %arg1: memref<64x32xf32, #tpu.memory_space<vmem>>, %arg2: memref<20x32xf32, #tpu.memory_space<vmem>>, %arg3: memref<1x20xf32, #tpu.memory_space<vmem>>, %arg4: memref<2x20xf32, #tpu.memory_space<vmem>>, %arg5: memref<1x2xf32, #tpu.memory_space<vmem>>, %arg6: memref<64x2xf32, #tpu.memory_space<vmem>>) attributes {dimension_semantics = [#tpu.dimension_semantics<parallel>], iteration_bounds = array<i64: 1>, scalar_prefetch = 0 : i64, scratch_operands = 0 : i64, tpu.core_type = #tpu.core_type<tc>, window_params = [{transform_indices = @transform_0, window_bounds = array<i64: 64, 32>}, {pipeline_mode = #tpu.pipeline_mode<synchronous>, transform_indices = @transform_1, window_bounds = array<i64: 20, 32>}, {pipeline_mode = #tpu.pipeline_mode<synchronous>, transform_indices = @transform_2, window_bounds = array<i64: 1, 20>}, {pipeline_mode = #tpu.pipeline_mode<synchronous>, transform_indices = @transform_3, window_bounds = array<i64: 2, 20>}, {pipeline_mode = #tpu.pipeline_mode<synchronous>, transform_indices = @transform_4, window_bounds = array<i64: 1, 2>}, {transform_indices = @transform_5, window_bounds = array<i64: 64, 2>}]} {
    %c0 = arith.constant 0 : index
    %c0_0 = arith.constant 0 : index
    %0 = vector.load %arg1[%c0, %c0_0] : memref<64x32xf32, #tpu.memory_space<vmem>>, vector<64x32xf32>
    %c0_1 = arith.constant 0 : index
    %c0_2 = arith.constant 0 : index
    %1 = vector.load %arg2[%c0_1, %c0_2] : memref<20x32xf32, #tpu.memory_space<vmem>>, vector<20x32xf32>
    %cst = arith.constant dense<0.000000e+00> : vector<64x20xf32>
    %2 = tpu.matmul %0, %1, %cst {dimension_numbers = #tpu.dot_dimension_numbers<[1], [1], [0], [0], [0, 0, 1, 0], [], []>} : vector<64x32xf32>, vector<20x32xf32>, vector<64x20xf32> -> vector<64x20xf32>
    %c0_3 = arith.constant 0 : index
    %c0_4 = arith.constant 0 : index
    %3 = vector.load %arg3[%c0_3, %c0_4] : memref<1x20xf32, #tpu.memory_space<vmem>>, vector<1x20xf32>
    %4 = vector.broadcast %3 : vector<1x20xf32> to vector<64x20xf32>
    %5 = arith.addf %2, %4 : vector<64x20xf32>
    %6 = math.tanh %5 : vector<64x20xf32>
    %c0_5 = arith.constant 0 : index
    %c0_6 = arith.constant 0 : index
    %7 = vector.load %arg4[%c0_5, %c0_6] : memref<2x20xf32, #tpu.memory_space<vmem>>, vector<2x20xf32>
    %cst_7 = arith.constant dense<0.000000e+00> : vector<64x2xf32>
    %8 = tpu.matmul %6, %7, %cst_7 {dimension_numbers = #tpu.dot_dimension_numbers<[1], [1], [0], [0], [0, 0, 1, 0], [], []>} : vector<64x20xf32>, vector<2x20xf32>, vector<64x2xf32> -> vector<64x2xf32>
    %c0_8 = arith.constant 0 : index
    %c0_9 = arith.constant 0 : index
    %9 = vector.load %arg5[%c0_8, %c0_9] : memref<1x2xf32, #tpu.memory_space<vmem>>, vector<1x2xf32>
    %10 = vector.broadcast %9 : vector<1x2xf32> to vector<64x2xf32>
    %11 = arith.addf %8, %10 : vector<64x2xf32>
    %c0_10 = arith.constant 0 : index
    %c0_11 = arith.constant 0 : index
    %12 = vector.load %arg6[%c0_10, %c0_11] : memref<64x2xf32, #tpu.memory_space<vmem>>, vector<64x2xf32>
    tpu.vector_store %arg6[%c0_10, %c0_11], %11 {strides = array<i32>} : memref<64x2xf32, #tpu.memory_space<vmem>>, vector<64x2xf32>,
    return
  }
  func.func @transform_0(%arg0: i32) -> (i32, i32) {
    %c0_i32 = arith.constant 0 : i32
    %c0_i32_0 = arith.constant 0 : i32
    return %arg0, %c0_i32 : i32, i32
  }
  func.func @transform_1(%arg0: i32) -> (i32, i32) {
    %c0_i32 = arith.constant 0 : i32
    %c0_i32_0 = arith.constant 0 : i32
    %c0_i32_1 = arith.constant 0 : i32
    return %c0_i32, %c0_i32_0 : i32, i32
  }
  func.func @transform_2(%arg0: i32) -> (i32, i32) {
    %c0_i32 = arith.constant 0 : i32
    %c0_i32_0 = arith.constant 0 : i32
    %c0_i32_1 = arith.constant 0 : i32
    return %c0_i32, %c0_i32_0 : i32, i32
  }
  func.func @transform_3(%arg0: i32) -> (i32, i32) {
    %c0_i32 = arith.constant 0 : i32
    %c0_i32_0 = arith.constant 0 : i32
    %c0_i32_1 = arith.constant 0 : i32
    return %c0_i32, %c0_i32_0 : i32, i32
  }
  func.func @transform_4(%arg0: i32) -> (i32, i32) {
    %c0_i32 = arith.constant 0 : i32
    %c0_i32_0 = arith.constant 0 : i32
    %c0_i32_1 = arith.constant 0 : i32
    return %c0_i32, %c0_i32_0 : i32, i32
  }
  func.func @transform_5(%arg0: i32) -> (i32, i32) {
    %c0_i32 = arith.constant 0 : i32
    %c0_i32_0 = arith.constant 0 : i32
    return %arg0, %c0_i32 : i32, i32
  }
}

</mosaic_0001>

<bundles_post_ra>
// kernel: tpu_custom_call.1
= control target key start
LH: loop header
LB: loop body
LE: loop exit
PB: predicated region body
PF: predicated region fallthrough
CT: control target
= control target key end

     0   :  { %vm38_vm0 = vcmask 261120   ;;  %vm193_vm2 = vcmask 162816   ;;  %vm326_vm3 = vcmask 15360   ;;  %s561_s1 = inlined_call_operand.vmem [shape: f32[20,32], index: 1, kind: input, shape index: {}]   ;;  %s562_s0 = inlined_call_operand.vmem [shape: f32[64,32], index: 0, kind: input, shape index: {}]   ;;  %s563_s3 = inlined_call_operand.vmem [shape: f32[2,20], index: 3, kind: input, shape index: {}]   ;;  %s564_s2 = inlined_call_operand.vmem [shape: f32[1,20], index: 2, kind: input, shape index: {}]   ;;  %s565_s4 = inlined_call_operand.vmem [shape: f32[1,2], index: 4, kind: input, shape index: {}]   ;;  %s566_s5 = inlined_call_operand.vmem [shape: f32[64,2], index: 5, kind: output, shape index: {}]  }
   0x1   :  { %v28_v0 = vld [vmem:[%s561_s1] sm:$0xff]  ;;  %v29_v1 = vld [vmem:[%s561_s1 + $0x8] sm:$0xff]  ;;  %vm414_vm1 = vmpackc.low %vm38_vm0, %vm38_vm0 }
   0x2   :  { %v413_v2 = vpack.c.bf16 %v29_v1, %v28_v0  ;;  %v20_v3 = vld [vmem:[%s562_s0] sm:$0xff]  ;;  %v30_v4 = vld [vmem:[%s561_s1 + $0x10] sm:$0xf]  ;;  %v21_v5 = vld [vmem:[%s562_s0 + $0x8] sm:$0xff] }
   0x3   :  { %387 = vmatprep.mubr.msk.f32.mxu0 %vm38_vm0, %v20_v3  ;;  %v22_v6 = vld [vmem:[%s562_s0 + $0x10] sm:$0xff]  ;;  %v23_v7 = vld [vmem:[%s562_s0 + $0x18] sm:$0xff]  ;;  %v24_v8 = vld [vmem:[%s562_s0 + $0x20] sm:$0xff] }
   0x4   :  { %415 = vmatprep.subr.msk.bf16.mxu0 %vm414_vm1, %v413_v2  ;;  %v25_v9 = vld [vmem:[%s562_s0 + $0x28] sm:$0xff]  ;;  %v26_v10 = vld [vmem:[%s562_s0 + $0x30] sm:$0xff]  ;;  %v27_v11 = vld [vmem:[%s562_s0 + $0x38] sm:$0xff] }
   0x5   :  { %418 = vmatpush3.bf16.xpose.msk.msra.mxu0 %vm414_vm1, %v413_v2  ;;  %v185_v12 = vld [vmem:[%s563_s3] sm:$0x3] }
   0x6   :  { %385 = vmatprep.subr.msk.mxu0 %vm38_vm0, %v30_v4  ;;  %399 = vmatprep.subr.msk.mxu1 %vm193_vm2, %v185_v12  ;;  %v339_v13 = vld [vmem:[%s564_s2] ss:$0 sm:$0xff] }
   0x7   :  { %400 = vmatpush3.xpose.msk.msra.mxu1 %vm193_vm2, %v185_v12  ;;  %v351_v38 = vld [vmem:[%s565_s4] ss:$0 sm:$0xff] }
   0xd   :  { %386 = vmatpush3.xpose.msk.msra.mxu0 %vm38_vm0, %v30_v4 }
  0x10   :  { %388 = vmatmul.mubr.msk.f32.vlgmr.msra.gmra.mrb[0].mxu0 %vm38_vm0, %v21_v5 }
  0x11   :  { %390 = vmatprep.mubr.msk.f32.mxu0 %vm38_vm0, %v22_v6 }
  0x14   :  { %391 = vmatmul.mubr.msk.f32.gmra.mrb[2].mxu0 %vm38_vm0, %v23_v7 }
  0x15   :  { %393 = vmatprep.mubr.msk.f32.mxu0 %vm38_vm0, %v24_v8 }
  0x18   :  { %394 = vmatmul.mubr.msk.f32.gmra.mrb[4].mxu0 %vm38_vm0, %v25_v9 }
  0x19   :  { %396 = vmatprep.mubr.msk.f32.mxu0 %vm38_vm0, %v26_v10 }
  0x1c   :  { %397 = vmatmul.mubr.msk.f32.gmra.mrb[6].mxu0 %vm38_vm0, %v27_v11 }
  0xe3   :  { %v389_v14 = vpop.f32.mrb[0].mxu0 }
  0xe4   :  { %v144_v15 = vadd.f32 %v389_v14, %v339_v13  ;;  %v138_v16 = vpop.f32.mrb[1].mxu0 }
  0xe5   :  { %v139_v17 = vadd.f32 %v339_v13, %v138_v16 }
  0xe7   :  { %419 = vtanh.f32 %v139_v17  ;;  %v392_v18 = vpop.f32.mrb[2].mxu0 }
  0xe8   :  { %421 = vtanh.f32 %v144_v15  ;;  %v154_v19 = vadd.f32 %v392_v18, %v339_v13  ;;  %v148_v20 = vpop.f32.mrb[3].mxu0 }
  0xe9   :  { %v149_v21 = vadd.f32 %v339_v13, %v148_v20 }
  0xeb   :  { %423 = vtanh.f32 %v149_v21  ;;  %v395_v22 = vpop.f32.mrb[4].mxu0 }
  0xec   :  { %425 = vtanh.f32 %v154_v19  ;;  %v164_v23 = vadd.f32 %v395_v22, %v339_v13  ;;  %v158_v24 = vpop.f32.mrb[5].mxu0 }
  0xed   :  { %v159_v25 = vadd.f32 %v339_v13, %v158_v24 }
  0xef   :  { %427 = vtanh.f32 %v159_v25  ;;  %v398_v26 = vpop.f32.mrb[6].mxu0 }
  0xf0   :  { %429 = vtanh.f32 %v164_v23  ;;  %v174_v27 = vadd.f32 %v398_v26, %v339_v13  ;;  %v168_v28 = vpop.f32.mrb[7].mxu0 }
  0xf1   :  { %v420_v29 = vpop.eup %419  ;;  %v169_v30 = vadd.f32 %v339_v13, %v168_v28 }
  0xf2   :  { %v422_v31 = vpop.eup %421  ;;  %401 = vmatprep.mubr.msk.f32.mxu1 %vm193_vm2, %v420_v29 }
  0xf3   :  { %431 = vtanh.f32 %v169_v30  ;;  %402 = vmatmul.mubr.msk.f32.vlgmr.msra.gmra.mrb[0].mxu1 %vm193_vm2, %v422_v31 }
  0xf4   :  { %433 = vtanh.f32 %v174_v27 }
  0xf5   :  { %v424_v32 = vpop.eup %423 }
  0xf6   :  { %v426_v33 = vpop.eup %425  ;;  %404 = vmatprep.mubr.msk.f32.mxu1 %vm193_vm2, %v424_v32 }
  0xf7   :  { %405 = vmatmul.mubr.msk.f32.gmra.mrb[2].mxu1 %vm193_vm2, %v426_v33 }
  0xf9   :  { %v428_v34 = vpop.eup %427 }
  0xfa   :  { %v430_v35 = vpop.eup %429  ;;  %407 = vmatprep.mubr.msk.f32.mxu1 %vm193_vm2, %v428_v34 }
  0xfb   :  { %408 = vmatmul.mubr.msk.f32.gmra.mrb[4].mxu1 %vm193_vm2, %v430_v35 }
  0xfd   :  { %v432_v36 = vpop.eup %431 }
  0xfe   :  { %v434_v37 = vpop.eup %433  ;;  %410 = vmatprep.mubr.msk.f32.mxu1 %vm193_vm2, %v432_v36 }
  0xff   :  { %411 = vmatmul.mubr.msk.f32.gmra.mrb[6].mxu1 %vm193_vm2, %v434_v37 }
 0x1c6   :  { %v403_v39 = vpop.f32.mrb[0].mxu1 }
 0x1c7   :  { %v293_v40 = vadd.f32 %v403_v39, %v351_v38  ;;  %v287_v41 = vpop.f32.mrb[1].mxu1 }
 0x1c8   :  { %v288_v42 = vadd.f32 %v351_v38, %v287_v41 }
 0x1c9   :  { %328 = vst.msk [vmem:[%s566_s5 + $0x8] sm:$0xff] %vm326_vm3, %v293_v40 }
 0x1ca   :  { %327 = vst.msk [vmem:[%s566_s5] sm:$0xff] %vm326_vm3, %v288_v42  ;;  %v406_v43 = vpop.f32.mrb[2].mxu1 }
 0x1cb   :  { %v303_v44 = vadd.f32 %v406_v43, %v351_v38  ;;  %v297_v45 = vpop.f32.mrb[3].mxu1 }
 0x1cc   :  { %v298_v46 = vadd.f32 %v351_v38, %v297_v45 }
 0x1cd   :  { %330 = vst.msk [vmem:[%s566_s5 + $0x18] sm:$0xff] %vm326_vm3, %v303_v44 }
 0x1ce   :  { %329 = vst.msk [vmem:[%s566_s5 + $0x10] sm:$0xff] %vm326_vm3, %v298_v46  ;;  %v409_v47 = vpop.f32.mrb[4].mxu1 }
 0x1cf   :  { %v313_v48 = vadd.f32 %v409_v47, %v351_v38  ;;  %v307_v49 = vpop.f32.mrb[5].mxu1 }
 0x1d0   :  { %v308_v50 = vadd.f32 %v351_v38, %v307_v49 }
 0x1d1   :  { %332 = vst.msk [vmem:[%s566_s5 + $0x28] sm:$0xff] %vm326_vm3, %v313_v48 }
 0x1d2   :  { %331 = vst.msk [vmem:[%s566_s5 + $0x20] sm:$0xff] %vm326_vm3, %v308_v50  ;;  %v412_v51 = vpop.f32.mrb[6].mxu1 }
 0x1d3   :  { %v323_v52 = vadd.f32 %v412_v51, %v351_v38  ;;  %v317_v53 = vpop.f32.mrb[7].mxu1 }
 0x1d4   :  { %v318_v54 = vadd.f32 %v351_v38, %v317_v53 }
 0x1d5   :  { %334 = vst.msk [vmem:[%s566_s5 + $0x38] sm:$0xff] %vm326_vm3, %v323_v52 }
 0x1d6   :  { %333 = vst.msk [vmem:[%s566_s5 + $0x30] sm:$0xff] %vm326_vm3, %v318_v54 }

</bundles_post_ra>
